<compile_context>
chip_gen: v7x
topology: tpu7x:2x2x1
jax: 0.10.0
libtpu: 0.0.40
codegen_flags: <defaults>
</compile_context>

<pallas_src>
import jax
import jax.numpy as jnp
from jax import lax
from jax.experimental import pallas as pl
from jax.experimental.pallas import tpu as pltpu


# ----------------------------------------------------------------------------
# Fused Pallas kernel: conv_in + all residual layers + conv_out
# ----------------------------------------------------------------------------
def make_fused_stack_call(N, D, T, F, NC, L, dil_down, dil_up,
                          compute_dtype=jnp.float32, out_dtype=jnp.float32):
    """One kernel per batch sample; f (F, T) stays in VMEM across all layers.

    dil_down/dil_up are compile-time dilation tuples (len L)."""

    five_f = 5 * F

    def kernel(x_ref, w_in_ref, b_in_ref, wl_ref, bl_ref, w_out_ref, b_out_ref,
               o_ref):
        # time-index grid for masking the rolled (wrapped) entries
        t_idx = lax.broadcasted_iota(jnp.int32, (F, T), 1)

        def shift_back(v, d):  # out[:, t] = v[:, t - d], zero for t < d
            rolled = pltpu.roll(v, shift=d % T, axis=1)
            return jnp.where(t_idx >= d, rolled, jnp.zeros_like(rolled))

        def shift_fwd(v, d):   # out[:, t] = v[:, t + d], zero for t >= T - d
            rolled = pltpu.roll(v, shift=(-d) % T, axis=1)
            return jnp.where(t_idx < T - d, rolled, jnp.zeros_like(rolled))

        # conv_in: (F, D) @ (D, T)  -> f32 accumulator, f32 elementwise
        x = x_ref[0]                                   # (D, T), compute_dtype
        f = jnp.dot(w_in_ref[...], x,
                    preferred_element_type=jnp.float32) + b_in_ref[...]

        # residual dilated layers (unrolled; dilations are static)
        for i in range(L):
            d_dn = dil_down[i]
            d_up = dil_up[i]
            # pack the 5 distinct taps along channels:
            #   [x[t-d_dn], x[t+d_dn], x[t], x[t-d_up], x[t+d_up]]
            packed = jnp.concatenate(
                [shift_back(f, d_dn), shift_fwd(f, d_dn), f,
                 shift_back(f, d_up), shift_fwd(f, d_up)],
                axis=0).astype(compute_dtype)          # (5F, T)
            fused = jnp.dot(wl_ref[i], packed,
                            preferred_element_type=jnp.float32) + bl_ref[i]
            # TODO(synk): nn.Dropout() is identity in eval mode; train-mode
            # dropout is not modeled.
            f = jnp.maximum(fused, 0.0) + f            # ReLU + residual, f32

        # conv_out: (NC, F) @ (F, T)
        out = jnp.dot(w_out_ref[...], f.astype(compute_dtype),
                      preferred_element_type=jnp.float32) + b_out_ref[...]
        o_ref[0] = out.astype(o_ref.dtype)

    # TODO(synk): for very long T on v7x (64 MiB VMEM), tile T with a
    # receptive-field halo and add a parallel T-tile grid axis; unnecessary at
    # these sizes.
    return pl.pallas_call(
        kernel,
        out_shape=jax.ShapeDtypeStruct((N, NC, T), out_dtype),
        grid=(N,),
        in_specs=[
            pl.BlockSpec((1, D, T), lambda n: (n, 0, 0)),      # x (NCT)
            pl.BlockSpec((F, D), lambda n: (0, 0)),            # conv_in W
            pl.BlockSpec((F, 1), lambda n: (0, 0)),            # conv_in b
            pl.BlockSpec((L, F, five_f), lambda n: (0, 0, 0)),  # packed layer W
            pl.BlockSpec((L, F, 1), lambda n: (0, 0, 0)),       # combined layer b
            pl.BlockSpec((NC, F), lambda n: (0, 0)),            # conv_out W
            pl.BlockSpec((NC, 1), lambda n: (0, 0)),            # conv_out b
        ],
        out_specs=pl.BlockSpec((1, NC, T), lambda n: (n, 0, 0)),
        compiler_params=pltpu.CompilerParams(
            dimension_semantics=("parallel",),
            vmem_limit_bytes=48 * 1024 * 1024,
        ),
    )


# ----------------------------------------------------------------------------
# Parameters (deterministic synthetic init, PyTorch Conv1d weight shapes)
# ----------------------------------------------------------------------------
def init_params(key, num_layers, num_f_maps, dim, num_classes, scale=0.1):
    ks = jax.random.split(key, 4 + 6 * num_layers)
    it = iter(range(len(ks)))
    nrm = lambda shape: scale * jax.random.normal(ks[next(it)], shape, jnp.float32)
    p = {
        "w_in": nrm((num_f_maps, dim, 1)),
        "b_in": nrm((num_f_maps,)),
        "w_out": nrm((num_classes, num_f_maps, 1)),
        "b_out": nrm((num_classes,)),
        "layers": [],
    }
    for _ in range(num_layers):
        p["layers"].append(
            dict(
                wd=nrm((num_f_maps, num_f_maps, 3)),
                bd=nrm((num_f_maps,)),
                wu=nrm((num_f_maps, num_f_maps, 3)),
                bu=nrm((num_f_maps,)),
                wf=nrm((num_f_maps, 2 * num_f_maps, 1)),
                bf=nrm((num_f_maps,)),
            )
        )
    return p


# ----------------------------------------------------------------------------
# Forward pass (wrapper = tiny weight-folding glue; compute = one Pallas kernel)
# ----------------------------------------------------------------------------
def prediction_generation_forward(params, x_nct, mask, num_layers,
                                  compute_dtype=jnp.float32):
    del mask  # mask is accepted but unused in the reference forward()
    N, D, T = x_nct.shape
    F = params["w_in"].shape[0]
    NC = params["w_out"].shape[0]
    L = num_layers

    dil_down = tuple(2 ** (L - 1 - i) for i in range(L))
    dil_up = tuple(2 ** i for i in range(L))

    # conv_in / conv_out weights stay in (Cout, Cin) form (NCT-native).
    w_in = params["w_in"][:, :, 0].astype(compute_dtype)        # (F, D)
    b_in = params["b_in"].reshape(F, 1)                          # f32
    w_out = params["w_out"][:, :, 0].astype(compute_dtype)       # (NC, F)
    b_out = params["b_out"].reshape(NC, 1)                       # f32

    # Fold the 1x1 fusion conv into the dilated taps and pack both branches.
    Ws, bs = [], []
    for i in range(L):
        lp = params["layers"][i]
        wf = lp["wf"][:, :, 0]                                   # (F, 2F)
        wf_d, wf_u = wf[:, :F], wf[:, F:]
        # Wc[k][o, i] = sum_c wf[o, c] * w[c, i, k]
        Wcd = jnp.einsum("oc,cik->oik", wf_d, lp["wd"])          # (F, F, 3)
        Wcu = jnp.einsum("oc,cik->oik", wf_u, lp["wu"])          # (F, F, 3)
        # tap order must match the in-kernel packing:
        #   [back(d_dn), fwd(d_dn), center, back(d_up), fwd(d_up)]
        Ws.append(jnp.concatenate(
            [Wcd[:, :, 0], Wcd[:, :, 2], Wcd[:, :, 1] + Wcu[:, :, 1],
             Wcu[:, :, 0], Wcu[:, :, 2]], axis=1))               # (F, 5F)
        bs.append((wf_d @ lp["bd"] + wf_u @ lp["bu"]
                   + lp["bf"]).reshape(F, 1))                    # (F, 1)
    W_layers = jnp.stack(Ws).astype(compute_dtype)               # (L, F, 5F)
    b_layers = jnp.stack(bs)                                     # (L, F, 1) f32

    call = make_fused_stack_call(N, D, T, F, NC, L, dil_down, dil_up,
                                 compute_dtype=compute_dtype)
    return call(x_nct.astype(compute_dtype), w_in, b_in, W_layers, b_layers,
                w_out, b_out)                                    # (N, NC, T)


# ----------------------------------------------------------------------------
# Pure-JAX reference (for correctness check)
# ----------------------------------------------------------------------------
def _conv1d_ref(x_nct, w, b, dilation=1, padding=0):
    out = lax.conv_general_dilated(
        x_nct, w,
        window_strides=(1,),
        padding=[(padding, padding)],
        rhs_dilation=(dilation,),
        dimension_numbers=("NCH", "OIH", "NCH"),
    )
    return out + b[None, :, None]


def reference_forward(params, x_nct, num_layers):
    f = _conv1d_ref(x_nct, params["w_in"], params["b_in"])
    for i in range(num_layers):
        lp = params["layers"][i]
        d_down = 2 ** (num_layers - 1 - i)
        d_up = 2 ** i
        f_in = f
        f_down = _conv1d_ref(f, lp["wd"], lp["bd"], dilation=d_down, padding=d_down)
        f_up = _conv1d_ref(f, lp["wu"], lp["bu"], dilation=d_up, padding=d_up)
        f = _conv1d_ref(jnp.concatenate([f_down, f_up], axis=1), lp["wf"], lp["bf"])
        f = jnp.maximum(f, 0.0)  # ReLU; dropout is identity (eval)
        f = f + f_in
    return _conv1d_ref(f, params["w_out"], params["b_out"])


# ----------------------------------------------------------------------------
if __name__ == "__main__":
    num_layers, num_f_maps, dim, num_classes = 3, 32, 16, 8
    N, T = 2, 128

    key = jax.random.PRNGKey(0)
    kx, kp = jax.random.split(key)
    x = jax.random.normal(kx, (N, dim, T), jnp.float32)        # PyTorch NCT layout
    mask = jnp.ones((N, num_classes, T), jnp.float32)          # unused by forward()
    params = init_params(kp, num_layers, num_f_maps, dim, num_classes)

    ref = reference_forward(params, x, num_layers)

    # f32 path: exact semantics of the PyTorch module.
    out = jax.block_until_ready(
        prediction_generation_forward(params, x, mask, num_layers,
                                      compute_dtype=jnp.float32))
    assert out.shape == (N, num_classes, T)
    assert jnp.allclose(out, ref, atol=1e-4, rtol=1e-4), "f32 mismatch vs reference"

    # bf16 MXU-input path (v6e/v7x fast path): f32 accumulate + f32 elementwise.
    out_bf16 = jax.block_until_ready(
        prediction_generation_forward(params, x, mask, num_layers,
                                      compute_dtype=jnp.bfloat16))
    assert jnp.allclose(out_bf16, ref, atol=5e-2, rtol=5e-2), "bf16 mismatch vs reference"

    print("KERNEL_OK")
</pallas_src>

<mosaic_0001>
module attributes {stable_mosaic.version = 11 : i64} {
  func.func @kernel(%arg0: i32, %arg1: memref<1x16x128xf32, #tpu.memory_space<vmem>>, %arg2: memref<32x16xf32, #tpu.memory_space<vmem>>, %arg3: memref<32x1xf32, #tpu.memory_space<vmem>>, %arg4: memref<3x32x160xf32, #tpu.memory_space<vmem>>, %arg5: memref<3x32x1xf32, #tpu.memory_space<vmem>>, %arg6: memref<8x32xf32, #tpu.memory_space<vmem>>, %arg7: memref<8x1xf32, #tpu.memory_space<vmem>>, %arg8: memref<1x8x128xf32, #tpu.memory_space<vmem>>) attributes {dimension_semantics = [#tpu.dimension_semantics<parallel>], iteration_bounds = array<i64: 2>, scalar_prefetch = 0 : i64, scratch_operands = 0 : i64, tpu.core_type = #tpu.core_type<tc>, window_params = [{transform_indices = @transform_0, window_bounds = array<i64: 1, 16, 128>}, {pipeline_mode = #tpu.pipeline_mode<synchronous>, transform_indices = @transform_1, window_bounds = array<i64: 32, 16>}, {pipeline_mode = #tpu.pipeline_mode<synchronous>, transform_indices = @transform_2, window_bounds = array<i64: 32, 1>}, {pipeline_mode = #tpu.pipeline_mode<synchronous>, transform_indices = @transform_3, window_bounds = array<i64: 3, 32, 160>}, {pipeline_mode = #tpu.pipeline_mode<synchronous>, transform_indices = @transform_4, window_bounds = array<i64: 3, 32, 1>}, {pipeline_mode = #tpu.pipeline_mode<synchronous>, transform_indices = @transform_5, window_bounds = array<i64: 8, 32>}, {pipeline_mode = #tpu.pipeline_mode<synchronous>, transform_indices = @transform_6, window_bounds = array<i64: 8, 1>}, {transform_indices = @transform_7, window_bounds = array<i64: 1, 8, 128>}]} {
    %0 = tpu.iota {dimensions = array<i32: 1>} : vector<32x128xi32>
    %c0 = arith.constant 0 : index
    %c0_0 = arith.constant 0 : index
    %c0_1 = arith.constant 0 : index
    %1 = vector.load %arg1[%c0, %c0_0, %c0_1] : memref<1x16x128xf32, #tpu.memory_space<vmem>>, vector<1x16x128xf32>
    %2 = vector.shape_cast %1 : vector<1x16x128xf32> to vector<16x128xf32>
    %c0_2 = arith.constant 0 : index
    %c0_3 = arith.constant 0 : index
    %3 = vector.load %arg2[%c0_2, %c0_3] : memref<32x16xf32, #tpu.memory_space<vmem>>, vector<32x16xf32>
    %cst = arith.constant dense<0.000000e+00> : vector<32x128xf32>
    %4 = tpu.matmul %3, %2, %cst {dimension_numbers = #tpu.dot_dimension_numbers<[1], [0], [0], [1], [0, 0, 1, 1], [], []>} : vector<32x16xf32>, vector<16x128xf32>, vector<32x128xf32> -> vector<32x128xf32>
    %c0_4 = arith.constant 0 : index
    %c0_5 = arith.constant 0 : index
    %5 = vector.load %arg3[%c0_4, %c0_5] : memref<32x1xf32, #tpu.memory_space<vmem>>, vector<32x1xf32>
    %6 = vector.broadcast %5 : vector<32x1xf32> to vector<32x128xf32>
    %7 = arith.addf %4, %6 : vector<32x128xf32>
    %c4_i32 = arith.constant 4 : i32
    %8 = tpu.dynamic_rotate %7 by %c4_i32 dim 1 : vector<32x128xf32>, i32 -> vector<32x128xf32>
    %c4_i32_6 = arith.constant 4 : i32
    %9 = vector.broadcast %c4_i32_6 : i32 to vector<32x128xi32>
    %10 = arith.cmpi sge, %0, %9 : vector<32x128xi32>
    %cst_7 = arith.constant 0.000000e+00 : f32
    %11 = vector.broadcast %cst_7 : f32 to vector<32x128xf32>
    %12 = arith.select %10, %8, %11 : vector<32x128xi1>, vector<32x128xf32>
    %c124_i32 = arith.constant 124 : i32
    %13 = tpu.dynamic_rotate %7 by %c124_i32 dim 1 : vector<32x128xf32>, i32 -> vector<32x128xf32>
    %c124_i32_8 = arith.constant 124 : i32
    %14 = vector.broadcast %c124_i32_8 : i32 to vector<32x128xi32>
    %15 = arith.cmpi slt, %0, %14 : vector<32x128xi32>
    %cst_9 = arith.constant 0.000000e+00 : f32
    %16 = vector.broadcast %cst_9 : f32 to vector<32x128xf32>
    %17 = arith.select %15, %13, %16 : vector<32x128xi1>, vector<32x128xf32>
    %c1_i32 = arith.constant 1 : i32
    %18 = tpu.dynamic_rotate %7 by %c1_i32 dim 1 : vector<32x128xf32>, i32 -> vector<32x128xf32>
    %c1_i32_10 = arith.constant 1 : i32
    %19 = vector.broadcast %c1_i32_10 : i32 to vector<32x128xi32>
    %20 = arith.cmpi sge, %0, %19 : vector<32x128xi32>
    %cst_11 = arith.constant 0.000000e+00 : f32
    %21 = vector.broadcast %cst_11 : f32 to vector<32x128xf32>
    %22 = arith.select %20, %18, %21 : vector<32x128xi1>, vector<32x128xf32>
    %c127_i32 = arith.constant 127 : i32
    %23 = tpu.dynamic_rotate %7 by %c127_i32 dim 1 : vector<32x128xf32>, i32 -> vector<32x128xf32>
    %c127_i32_12 = arith.constant 127 : i32
    %24 = vector.broadcast %c127_i32_12 : i32 to vector<32x128xi32>
    %25 = arith.cmpi slt, %0, %24 : vector<32x128xi32>
    %cst_13 = arith.constant 0.000000e+00 : f32
    %26 = vector.broadcast %cst_13 : f32 to vector<32x128xf32>
    %27 = arith.select %25, %23, %26 : vector<32x128xi1>, vector<32x128xf32>
    %28 = tpu.concatenate %12, %17, %7, %22, %27 in 0 : vector<32x128xf32>, vector<32x128xf32>, vector<32x128xf32>, vector<32x128xf32>, vector<32x128xf32> -> vector<160x128xf32>
    %c0_14 = arith.constant 0 : index
    %c0_15 = arith.constant 0 : index
    %c0_16 = arith.constant 0 : index
    %29 = vector.load %arg4[%c0_14, %c0_15, %c0_16] : memref<3x32x160xf32, #tpu.memory_space<vmem>>, vector<1x32x160xf32>
    %30 = vector.shape_cast %29 : vector<1x32x160xf32> to vector<32x160xf32>
    %cst_17 = arith.constant dense<0.000000e+00> : vector<32x128xf32>
    %31 = tpu.matmul %30, %28, %cst_17 {dimension_numbers = #tpu.dot_dimension_numbers<[1], [0], [0], [1], [0, 0, 1, 1], [], []>} : vector<32x160xf32>, vector<160x128xf32>, vector<32x128xf32> -> vector<32x128xf32>
    %c0_18 = arith.constant 0 : index
    %c0_19 = arith.constant 0 : index
    %c0_20 = arith.constant 0 : index
    %32 = vector.load %arg5[%c0_18, %c0_19, %c0_20] : memref<3x32x1xf32, #tpu.memory_space<vmem>>, vector<1x32x1xf32>
    %33 = vector.shape_cast %32 : vector<1x32x1xf32> to vector<32x1xf32>
    %34 = vector.broadcast %33 : vector<32x1xf32> to vector<32x128xf32>
    %35 = arith.addf %31, %34 : vector<32x128xf32>
    %cst_21 = arith.constant 0.000000e+00 : f32
    %36 = vector.broadcast %cst_21 : f32 to vector<32x128xf32>
    %37 = arith.maximumf %35, %36 : vector<32x128xf32>
    %38 = arith.addf %37, %7 : vector<32x128xf32>
    %c2_i32 = arith.constant 2 : i32
    %39 = tpu.dynamic_rotate %38 by %c2_i32 dim 1 : vector<32x128xf32>, i32 -> vector<32x128xf32>
    %c2_i32_22 = arith.constant 2 : i32
    %40 = vector.broadcast %c2_i32_22 : i32 to vector<32x128xi32>
    %41 = arith.cmpi sge, %0, %40 : vector<32x128xi32>
    %cst_23 = arith.constant 0.000000e+00 : f32
    %42 = vector.broadcast %cst_23 : f32 to vector<32x128xf32>
    %43 = arith.select %41, %39, %42 : vector<32x128xi1>, vector<32x128xf32>
    %c126_i32 = arith.constant 126 : i32
    %44 = tpu.dynamic_rotate %38 by %c126_i32 dim 1 : vector<32x128xf32>, i32 -> vector<32x128xf32>
    %c126_i32_24 = arith.constant 126 : i32
    %45 = vector.broadcast %c126_i32_24 : i32 to vector<32x128xi32>
    %46 = arith.cmpi slt, %0, %45 : vector<32x128xi32>
    %cst_25 = arith.constant 0.000000e+00 : f32
    %47 = vector.broadcast %cst_25 : f32 to vector<32x128xf32>
    %48 = arith.select %46, %44, %47 : vector<32x128xi1>, vector<32x128xf32>
    %c2_i32_26 = arith.constant 2 : i32
    %49 = tpu.dynamic_rotate %38 by %c2_i32_26 dim 1 : vector<32x128xf32>, i32 -> vector<32x128xf32>
    %c2_i32_27 = arith.constant 2 : i32
    %50 = vector.broadcast %c2_i32_27 : i32 to vector<32x128xi32>
    %51 = arith.cmpi sge, %0, %50 : vector<32x128xi32>
    %cst_28 = arith.constant 0.000000e+00 : f32
    %52 = vector.broadcast %cst_28 : f32 to vector<32x128xf32>
    %53 = arith.select %51, %49, %52 : vector<32x128xi1>, vector<32x128xf32>
    %c126_i32_29 = arith.constant 126 : i32
    %54 = tpu.dynamic_rotate %38 by %c126_i32_29 dim 1 : vector<32x128xf32>, i32 -> vector<32x128xf32>
    %c126_i32_30 = arith.constant 126 : i32
    %55 = vector.broadcast %c126_i32_30 : i32 to vector<32x128xi32>
    %56 = arith.cmpi slt, %0, %55 : vector<32x128xi32>
    %cst_31 = arith.constant 0.000000e+00 : f32
    %57 = vector.broadcast %cst_31 : f32 to vector<32x128xf32>
    %58 = arith.select %56, %54, %57 : vector<32x128xi1>, vector<32x128xf32>
    %59 = tpu.concatenate %43, %48, %38, %53, %58 in 0 : vector<32x128xf32>, vector<32x128xf32>, vector<32x128xf32>, vector<32x128xf32>, vector<32x128xf32> -> vector<160x128xf32>
    %c1 = arith.constant 1 : index
    %c0_32 = arith.constant 0 : index
    %c0_33 = arith.constant 0 : index
    %60 = vector.load %arg4[%c1, %c0_32, %c0_33] : memref<3x32x160xf32, #tpu.memory_space<vmem>>, vector<1x32x160xf32>
    %61 = vector.shape_cast %60 : vector<1x32x160xf32> to vector<32x160xf32>
    %cst_34 = arith.constant dense<0.000000e+00> : vector<32x128xf32>
    %62 = tpu.matmul %61, %59, %cst_34 {dimension_numbers = #tpu.dot_dimension_numbers<[1], [0], [0], [1], [0, 0, 1, 1], [], []>} : vector<32x160xf32>, vector<160x128xf32>, vector<32x128xf32> -> vector<32x128xf32>
    %c1_35 = arith.constant 1 : index
    %c0_36 = arith.constant 0 : index
    %c0_37 = arith.constant 0 : index
    %63 = vector.load %arg5[%c1_35, %c0_36, %c0_37] : memref<3x32x1xf32, #tpu.memory_space<vmem>>, vector<1x32x1xf32>
    %64 = vector.shape_cast %63 : vector<1x32x1xf32> to vector<32x1xf32>
    %65 = vector.broadcast %64 : vector<32x1xf32> to vector<32x128xf32>
    %66 = arith.addf %62, %65 : vector<32x128xf32>
    %cst_38 = arith.constant 0.000000e+00 : f32
    %67 = vector.broadcast %cst_38 : f32 to vector<32x128xf32>
    %68 = arith.maximumf %66, %67 : vector<32x128xf32>
    %69 = arith.addf %68, %38 : vector<32x128xf32>
    %c1_i32_39 = arith.constant 1 : i32
    %70 = tpu.dynamic_rotate %69 by %c1_i32_39 dim 1 : vector<32x128xf32>, i32 -> vector<32x128xf32>
    %c1_i32_40 = arith.constant 1 : i32
    %71 = vector.broadcast %c1_i32_40 : i32 to vector<32x128xi32>
    %72 = arith.cmpi sge, %0, %71 : vector<32x128xi32>
    %cst_41 = arith.constant 0.000000e+00 : f32
    %73 = vector.broadcast %cst_41 : f32 to vector<32x128xf32>
    %74 = arith.select %72, %70, %73 : vector<32x128xi1>, vector<32x128xf32>
    %c127_i32_42 = arith.constant 127 : i32
    %75 = tpu.dynamic_rotate %69 by %c127_i32_42 dim 1 : vector<32x128xf32>, i32 -> vector<32x128xf32>
    %c127_i32_43 = arith.constant 127 : i32
    %76 = vector.broadcast %c127_i32_43 : i32 to vector<32x128xi32>
    %77 = arith.cmpi slt, %0, %76 : vector<32x128xi32>
    %cst_44 = arith.constant 0.000000e+00 : f32
    %78 = vector.broadcast %cst_44 : f32 to vector<32x128xf32>
    %79 = arith.select %77, %75, %78 : vector<32x128xi1>, vector<32x128xf32>
    %c4_i32_45 = arith.constant 4 : i32
    %80 = tpu.dynamic_rotate %69 by %c4_i32_45 dim 1 : vector<32x128xf32>, i32 -> vector<32x128xf32>
    %c4_i32_46 = arith.constant 4 : i32
    %81 = vector.broadcast %c4_i32_46 : i32 to vector<32x128xi32>
    %82 = arith.cmpi sge, %0, %81 : vector<32x128xi32>
    %cst_47 = arith.constant 0.000000e+00 : f32
    %83 = vector.broadcast %cst_47 : f32 to vector<32x128xf32>
    %84 = arith.select %82, %80, %83 : vector<32x128xi1>, vector<32x128xf32>
    %c124_i32_48 = arith.constant 124 : i32
    %85 = tpu.dynamic_rotate %69 by %c124_i32_48 dim 1 : vector<32x128xf32>, i32 -> vector<32x128xf32>
    %c124_i32_49 = arith.constant 124 : i32
    %86 = vector.broadcast %c124_i32_49 : i32 to vector<32x128xi32>
    %87 = arith.cmpi slt, %0, %86 : vector<32x128xi32>
    %cst_50 = arith.constant 0.000000e+00 : f32
    %88 = vector.broadcast %cst_50 : f32 to vector<32x128xf32>
    %89 = arith.select %87, %85, %88 : vector<32x128xi1>, vector<32x128xf32>
    %90 = tpu.concatenate %74, %79, %69, %84, %89 in 0 : vector<32x128xf32>, vector<32x128xf32>, vector<32x128xf32>, vector<32x128xf32>, vector<32x128xf32> -> vector<160x128xf32>
    %c2 = arith.constant 2 : index
    %c0_51 = arith.constant 0 : index
    %c0_52 = arith.constant 0 : index
    %91 = vector.load %arg4[%c2, %c0_51, %c0_52] : memref<3x32x160xf32, #tpu.memory_space<vmem>>, vector<1x32x160xf32>
    %92 = vector.shape_cast %91 : vector<1x32x160xf32> to vector<32x160xf32>
    %cst_53 = arith.constant dense<0.000000e+00> : vector<32x128xf32>
    %93 = tpu.matmul %92, %90, %cst_53 {dimension_numbers = #tpu.dot_dimension_numbers<[1], [0], [0], [1], [0, 0, 1, 1], [], []>} : vector<32x160xf32>, vector<160x128xf32>, vector<32x128xf32> -> vector<32x128xf32>
    %c2_54 = arith.constant 2 : index
    %c0_55 = arith.constant 0 : index
    %c0_56 = arith.constant 0 : index
    %94 = vector.load %arg5[%c2_54, %c0_55, %c0_56] : memref<3x32x1xf32, #tpu.memory_space<vmem>>, vector<1x32x1xf32>
    %95 = vector.shape_cast %94 : vector<1x32x1xf32> to vector<32x1xf32>
    %96 = vector.broadcast %95 : vector<32x1xf32> to vector<32x128xf32>
    %97 = arith.addf %93, %96 : vector<32x128xf32>
    %cst_57 = arith.constant 0.000000e+00 : f32
    %98 = vector.broadcast %cst_57 : f32 to vector<32x128xf32>
    %99 = arith.maximumf %97, %98 : vector<32x128xf32>
    %100 = arith.addf %99, %69 : vector<32x128xf32>
    %c0_58 = arith.constant 0 : index
    %c0_59 = arith.constant 0 : index
    %101 = vector.load %arg6[%c0_58, %c0_59] : memref<8x32xf32, #tpu.memory_space<vmem>>, vector<8x32xf32>
    %cst_60 = arith.constant dense<0.000000e+00> : vector<8x128xf32>
    %102 = tpu.matmul %101, %100, %cst_60 {dimension_numbers = #tpu.dot_dimension_numbers<[1], [0], [0], [1], [0, 0, 1, 1], [], []>} : vector<8x32xf32>, vector<32x128xf32>, vector<8x128xf32> -> vector<8x128xf32>
    %c0_61 = arith.constant 0 : index
    %c0_62 = arith.constant 0 : index
    %103 = vector.load %arg7[%c0_61, %c0_62] : memref<8x1xf32, #tpu.memory_space<vmem>>, vector<8x1xf32>
    %104 = vector.broadcast %103 : vector<8x1xf32> to vector<8x128xf32>
    %105 = arith.addf %102, %104 : vector<8x128xf32>
    %c0_63 = arith.constant 0 : index
    %c0_64 = arith.constant 0 : index
    %c0_65 = arith.constant 0 : index
    %106 = vector.load %arg8[%c0_63, %c0_64, %c0_65] : memref<1x8x128xf32, #tpu.memory_space<vmem>>, vector<1x8x128xf32>
    %107 = vector.shape_cast %106 : vector<1x8x128xf32> to vector<8x128xf32>
    %108 = vector.shape_cast %105 : vector<8x128xf32> to vector<1x8x128xf32>
    tpu.vector_store %arg8[%c0_63, %c0_64, %c0_65], %108 {strides = array<i32>} : memref<1x8x128xf32, #tpu.memory_space<vmem>>, vector<1x8x128xf32>,
    return
  }
  func.func @transform_0(%arg0: i32) -> (i32, i32, i32) {
    %c0_i32 = arith.constant 0 : i32
    %c0_i32_0 = arith.constant 0 : i32
    %c0_i32_1 = arith.constant 0 : i32
    return %arg0, %c0_i32, %c0_i32_0 : i32, i32, i32
  }
  func.func @transform_1(%arg0: i32) -> (i32, i32) {
    %c0_i32 = arith.constant 0 : i32
    %c0_i32_0 = arith.constant 0 : i32
    %c0_i32_1 = arith.constant 0 : i32
    return %c0_i32, %c0_i32_0 : i32, i32
  }
  func.func @transform_2(%arg0: i32) -> (i32, i32) {
    %c0_i32 = arith.constant 0 : i32
    %c0_i32_0 = arith.constant 0 : i32
    %c0_i32_1 = arith.constant 0 : i32
    return %c0_i32, %c0_i32_0 : i32, i32
  }
  func.func @transform_3(%arg0: i32) -> (i32, i32, i32) {
    %c0_i32 = arith.constant 0 : i32
    %c0_i32_0 = arith.constant 0 : i32
    %c0_i32_1 = arith.constant 0 : i32
    %c0_i32_2 = arith.constant 0 : i32
    return %c0_i32, %c0_i32_0, %c0_i32_1 : i32, i32, i32
  }
  func.func @transform_4(%arg0: i32) -> (i32, i32, i32) {
    %c0_i32 = arith.constant 0 : i32
    %c0_i32_0 = arith.constant 0 : i32
    %c0_i32_1 = arith.constant 0 : i32
    %c0_i32_2 = arith.constant 0 : i32
    return %c0_i32, %c0_i32_0, %c0_i32_1 : i32, i32, i32
  }
  func.func @transform_5(%arg0: i32) -> (i32, i32) {
    %c0_i32 = arith.constant 0 : i32
    %c0_i32_0 = arith.constant 0 : i32
    %c0_i32_1 = arith.constant 0 : i32
    return %c0_i32, %c0_i32_0 : i32, i32
  }
  func.func @transform_6(%arg0: i32) -> (i32, i32) {
    %c0_i32 = arith.constant 0 : i32
    %c0_i32_0 = arith.constant 0 : i32
    %c0_i32_1 = arith.constant 0 : i32
    return %c0_i32, %c0_i32_0 : i32, i32
  }
  func.func @transform_7(%arg0: i32) -> (i32, i32, i32) {
    %c0_i32 = arith.constant 0 : i32
    %c0_i32_0 = arith.constant 0 : i32
    %c0_i32_1 = arith.constant 0 : i32
    return %arg0, %c0_i32, %c0_i32_0 : i32, i32, i32
  }
}

</mosaic_0001>

<bundles_post_ra>
// kernel: tpu_custom_call.1
= control target key start
LH: loop header
LB: loop body
LE: loop exit
PB: predicated region body
PF: predicated region fallthrough
CT: control target
= control target key end

     0   :  { %12 = vsyncpa [#allocation3], 0  ;;  %s2209_s0 = inlined_call_operand.hbm [shape: f32[2,16,128], index: 0, kind: input, shape index: {}]   ;;  %s2210_s1 = inlined_call_operand.vmem [shape: f32[32,16], index: 1, kind: input, shape index: {}]   ;;  %s2211_s2 = inlined_call_operand.vmem [shape: f32[32,1], index: 2, kind: input, shape index: {}]   ;;  %s2212_s3 = inlined_call_operand.vmem [shape: f32[3,32,160], index: 3, kind: input, shape index: {}]   ;;  %s2213_s4 = inlined_call_operand.vmem [shape: f32[3,32,1], index: 4, kind: input, shape index: {}]   ;;  %s2214_s5 = inlined_call_operand.vmem [shape: f32[8,32], index: 5, kind: input, shape index: {}]   ;;  %s2215_s6 = inlined_call_operand.vmem [shape: f32[8,1], index: 6, kind: input, shape index: {}]   ;;  %s2216_s7 = inlined_call_operand.hbm [shape: f32[2,8,128], index: 7, kind: output, shape index: {}]  }
   0x1   :  { %14 = vsyncpa [#allocation3 + $0x1], 0 }
   0x2   :  { %15 = vsyncpa [#allocation4], 0 }
   0x3   :  { %17 = vsyncpa [#allocation4 + $0x1], 0  ;;  %s1705_s24 = smov 0   ;;  %s1707_s25 = smov 0  }
   0x4   :  { %s1709_s26 = smov 0   ;;  %s1711_s27 = smov 0  }
   0x5 LB: > { %s1726_s28 = sadd.s32 4294967295, %s1649_s27   ;;  %s1134_s29 = sadd.s32 4294967294, %s1649_s27   ;;  %s1649_s27 = sphi %s1711_s27, %s2244_s27   ;;  %s1645_s26 = sphi %s1709_s26, %s2243_s26   ;;  %s1641_s25 = sphi %s1707_s25, %s2242_s25   ;;  %s1637_s24 = sphi %s1705_s24, %s2241_s24  }
   0x6   : > { %s1730_s30 = sadd.s32 1, %s1649_s27   ;;  %s30_s8 = sadd.s32 1, %s1645_s26 }
   0x7   : > { %s27_s9 = ssub.s32 %s1649_s27, %s1730_s30  ;;  %p37_p0 = scmp.ne.s32.totalorder %s1645_s26, %s1641_s25 }
   0x8   : > { %p28_p1 = scmp.eq.s32.totalorder %s27_s9, 0  ;;  %p38_p2 = scmp.eq.s32.totalorder %s1649_s27, 0 }
   0x9   : > { %p43_p3 = scmp.ne.s32.totalorder %s1641_s25, %s1637_s24  ;;  %p44_p4 = scmp.eq.s32.totalorder %s1726_s28, 0 }
   0xa   : > { %s1742_s10 = scalar_select %p28_p1, %s1645_s26, %s30_s8  }
   0xb   : > { %p1744_p5 = por %p38_p2, %p37_p0  ;;  %p1748_p6 = por %p44_p4, %p43_p3 }
   0xc   : > { %p193_p7 = scmp.eq.s32.totalorder %s1726_s28, 1  ;;  %p199_p8 = scmp.eq.s32.totalorder %s1134_s29, 1 }
   0xd   : > { %p1405_p10 = scmp.lt.s32.totalorder %s1649_s27, 2  ;;  %s237_s15 = sand.u32 1, %s1645_s26  }
   0xe   : > { %p1755_p11 = por %p193_p7, %p37_p0  ;;  %p1759_p12 = por %p199_p8, %p43_p3 }
   0xf   : > { %s1236_s16 = sshll.u32 %s1649_s27, 8  ;;  %s1137_s17 = sshll.u32 %s237_s15, 4 }
  0x10   : > { %s2222_s13 = scalar_select %p1755_p11, 1, 0 }
  0x11   : > { %s2223_s14 = scalar_select %p1759_p12, 1, 0 }
  0x12   : > { %s1768_s20 = scalar_lea.hbm %s2209_s0, %s1236_s16  ;;  %s241_s21 = scalar_lea.vmem [#allocation2], %s1137_s17 }
  0x13   : > { %s248_s22 = sshll.u32 %s241_s21, 4  ;;  %p1772_p13 = pnand %p1405_p10, %p1744_p5  ;;  %s1776_s22 = int_to_ptr.vmem [resolvable:$true] %s248_s22 }
  0x14   : > { %s1778_s29 = scalar_lea.sflag [#allocation3], %s237_s15  ;;  %s1553_s8 = scalar_lea.hbm %s1768_s20, 256 }
  0x15   : > { %p1554_p0 = scmp.ne.s32.totalorder %s1768_s20, %s1553_s8  ;;  %p1555_p1 = pneg %p1772_p13 }
  0x16   : > { %s1558_s16 = scalar_lea.hbm %s2209_s0, 512  ;;  %p1559_p4 = scmp.lt.u32.totalorder %s1768_s20, %s2209_s0 }
  0x17   : > { %p1556_p2 = pnand %p1555_p1, %p1554_p0  ;;  %p1560_p5 = scmp.lt.u32.totalorder %s1558_s16, %s1553_s8 }
  0x18   : > { %p1562_p8 = scmp.lt.u32.totalorder %s1553_s8, %s1768_s20 }
  0x19   : > { %p1557_p3 = pneg %p1556_p2  ;;  %p1561_p7 = por %p1560_p5, %p1559_p4 }
  0x1b   : > { %p1563_p10 = por %p1562_p8, %p1561_p7 }
  0x1d   : > { %p1564_p9 = pnand %p1563_p10, %p1557_p3 }
  0x1f   : > { %1567 = shalt.err (!%p1564_p9)
}
  0x20   : > { %s1568_s15 = scalar_lea.vmem %s1776_s22, 256  ;;  %s1651_s19 = smov [#allocation2]  }
  0x21   : > { %p1569_p0 = scmp.ne.s32.totalorder %s1776_s22, %s1568_s15  ;;  %s1573_s21 = sshll.u32 %s1651_s19, 4  ;;  %s1574_s21 = int_to_ptr.vmem [resolvable:$false] %s1573_s21 }
  0x22   : > { %s1575_s9 = scalar_lea.vmem %s1574_s21, 512  ;;  %p1576_p11 = scmp.lt.s32.totalorder %s1776_s22, %s1574_s21 }
  0x23   : > { %p1571_p2 = pnand %p1569_p0, %p1555_p1  ;;  %p1577_p4 = scmp.lt.s32.totalorder %s1575_s9, %s1568_s15 }
  0x25   : > { %p1572_p12 = pneg %p1571_p2  ;;  %p1578_p5 = por %p1577_p4, %p1576_p11 }
  0x27   : > { %p1579_p7 = pnand %p1578_p5, %p1572_p12 }
  0x29   : > { %1582 = shalt.err (!%p1579_p7)
}
  0x2a   : > { %s1652_s8 = smov 128   ;;  %s1653_s11 = smov 8  }
  0x2b   : > { %1400 = dma.hbm_to_vmem [thread:$0]  (!%p1772_p13), %s1768_s20, 256, %s1776_s22, %s1778_s29, %s1652_s8, %s1652_s8, %s1653_s11  }
  0x2c   : > { %p1140_p9 = scmp.ge.s32.totalorder %s1649_s27, 1  ;;  %p256_p1 = scmp.lt.s32.totalorder %s1649_s27, 3 }
  0x2e   : > { %p257_p3 = pnand %p1140_p9, %p256_p1 }
  0x2f   : > { %s1809_s16 = sand.u32 (!%p257_p3), 1, %s1641_s25  }
  0x30   : > { %260 = sbr.rel (%p257_p3) target bundleno = 1673 (0x689), region = 48  ;;  %s1141_s17 = sshll.u32 (!%p257_p3), %s1809_s16, 4 }
  0x31   : > { %s263_s18 = scalar_lea.sflag (!%p257_p3), [#allocation3], %s1809_s16  ;;  %s266_s15 = scalar_lea.vmem (!%p257_p3), [#allocation2], %s1141_s17 }
  0x37   : > { %1628 = dma.done.wait (%p1748_p6), %s263_s18, 256  }
  0x38   : > { %1630 = vsyncadd (%p1748_p6), %s263_s18, 4294967040  ;;  %v1654_v0 = vmov 0   ;;  %vm329_vm0 = vcmask 130048   ;;  %v299_v1 = vld [vmem:[%s266_s15] sm:$0xff]  ;;  %v300_v2 = vld [vmem:[%s266_s15 + $0x8] sm:$0xff]  ;;  %v1655_v13 = vmov 0.0|0.0   ;;  %v297_v32 = vlaneseq }
  0x39   : > { %1451 = vset.pattern.permute.xlu0 %v1654_v0  ;;  %1452 = vset.pattern.permute.xlu1 %v1654_v0  ;;  %v301_v3 = vld [vmem:[%s2210_s1] sm:$0xff]  ;;  %v1269_v4 = vpack.c.bf16 %v300_v2, %v299_v1  ;;  %v307_v6 = vld [vmem:[%s2211_s2 + $0x10] sm:$0xff]  ;;  %v302_v7 = vld [vmem:[%s2210_s1 + $0x8] sm:$0xff]  ;;  %s1656_s29 = smov 4   ;;  %s2218_s19 = smov 124   ;;  %vm511_vm1 = vcmask 261120  }
  0x3a   : > { %1252 = vmatprep.mubr.msk.f32.mxu0 %vm329_vm0, %v301_v3  ;;  %v305_v5 = vld [vmem:[%s2211_s2] sm:$0xff]  ;;  %321 = vperm.xlu1 %1452, %v307_v6   ;;  %v306_v8 = vld [vmem:[%s2211_s2 + $0x8] sm:$0xff]  ;;  %v303_v9 = vld [vmem:[%s2210_s1 + $0x10] sm:$0xff]  ;;  %s1658_s12 = smov 1   ;;  %s1659_s21 = smov 127   ;;  %v1883_v33 = vand.u32 127, %v297_v32 }
  0x3b   : > { %1270 = vmatprep.subr.bf16.mxu0 %v1269_v4  ;;  %311 = vperm.xlu0 %1451, %v305_v5   ;;  %v308_v10 = vld [vmem:[%s2211_s2 + $0x18] sm:$0xff]  ;;  %v487_v27 = vld [vmem:[%s2213_s4] sm:$0xff]  ;;  %v488_v28 = vld [vmem:[%s2213_s4 + $0x8] sm:$0xff]  ;;  %s1660_s20 = smov 2   ;;  %s1661_s22 = smov 126   ;;  %vm1662_vm14 = vmmov 0  }
  0x3c   : > { %1272 = vmatpush3.bf16.msra.mxu0 %v1269_v4  ;;  %v304_v11 = vld [vmem:[%s2210_s1 + $0x18] sm:$0xff]  ;;  %1273 = vmatprep.subr.bf16.mxu1 %v1655_v13  ;;  %v489_v29 = vld [vmem:[%s2213_s4 + $0x10] sm:$0xff]  ;;  %v480_v31 = vld [vmem:[%s2212_s3 + $0x8] sm:$0xff]  ;;  %vm435_vm2 = vcmp.ge.s32.totalorder %v1883_v33, 4  ;;  %vm448_vm4 = vcmp.lt.s32.totalorder %v1883_v33, 124  ;;  %vm461_vm6 = vcmp.ge.s32.totalorder %v1883_v33, 1 }
  0x3d   : > { %1311 = vmatprep.subr.bf16.mxu0 %v1655_v13  ;;  %v490_v30 = vld [vmem:[%s2213_s4 + $0x18] sm:$0xff]  ;;  %1163 = vmatprep.mubr.msk.f32.mxu1 %vm511_vm1, %v480_v31  ;;  %vm1886_vm3 = vmpackc.low %vm435_vm2, %vm435_vm2  ;;  %vm474_vm8 = vcmp.lt.s32.totalorder %v1883_v33, 127  ;;  %vm625_vm10 = vcmp.ge.s32.totalorder %v1883_v33, 2  ;;  %vm638_vm12 = vcmp.lt.s32.totalorder %v1883_v33, 126  ;;  %s2237_s11 = smov 124   ;;  %v1204_v47 = vld [vmem:[%s2212_s3 + $0xa8] sm:$0xff] }
  0x3e   : > { %326 = vperm.xlu1 %1452, %v308_v10   ;;  %vm1897_vm5 = vmpackc.low %vm448_vm4, %vm448_vm4  ;;  %v481_v10 = vld [vmem:[%s2212_s3 + $0x10] sm:$0xff]  ;;  %v1202_v37 = vld [vmem:[%s2212_s3 + $0x98] sm:$0xff]  ;;  %s1142_s15 = sshll.u32 %s1809_s16, 3  ;;  %s1233_s23 = sshll.u32 %s1726_s28, 7 }
  0x3f   : > { %1253 = vmatmul.mubr.msk.f32.vlgmr.msra.gmra.mrb[0].mxu0 %vm329_vm0, %v302_v7  ;;  %316 = vperm.xlu0 %1451, %v306_v8   ;;  %vm1914_vm7 = vmpackc.low %vm461_vm6, %vm461_vm6  ;;  %v479_v8 = vld [vmem:[%s2212_s3] sm:$0xff]  ;;  %p2238_p11 = scmp.ne.s32.totalorder %s2222_s13, 0  ;;  %s1664_s28 = smov [#allocation5]  }
  0x40   : > { %1255 = vmatprep.mubr.msk.f32.mxu0 %vm329_vm0, %v303_v9  ;;  %vm1925_vm9 = vmpackc.low %vm474_vm8, %vm474_vm8  ;;  %v482_v9 = vld [vmem:[%s2212_s3 + $0x18] sm:$0xff]  ;;  %s1587_s8 = sshll.u32 %s1664_s28, 4  ;;  %s1588_s8 = int_to_ptr.vmem [resolvable:$false] %s1587_s8 }
  0x41   : > { %vm1992_vm11 = vmpackc.low %vm625_vm10, %vm625_vm10 }
  0x42   : > { %vm2003_vm13 = vmpackc.low %vm638_vm12, %vm638_vm12 }
  0x43   : > { %1256 = vmatmul.mubr.msk.f32.gmra.mrb[2].mxu0 %vm329_vm0, %v304_v11  ;;  %v484_v11 = vld [vmem:[%s2212_s3 + $0x28] sm:$0xff] }
  0xb9   : > { %v322_v14 = vpop.permute.xlu1 %321 }
  0xba   : > { %v312_v12 = vpop.permute.xlu0 %311 }
  0xbd   : > { %v327_v20 = vpop.permute.xlu1 %326 }
  0xbe   : > { %v317_v15 = vpop.permute.xlu0 %316 }
 0x112   : > { %v1254_v16 = vpop.f32.mrb[0].mxu0 }
 0x113   : > { %v1847_v17 = vadd.f32 %v1254_v16, %v317_v15  ;;  %v408_v18 = vpop.f32.mrb[1].mxu0  ;;  %v485_v15 = vld [vmem:[%s2212_s3 + $0x30] sm:$0xff] }
 0x114   : > { %v1849_v19 = vadd.f32 %v408_v18, %v312_v12  ;;  %v483_v12 = vld [vmem:[%s2212_s3 + $0x20] sm:$0xff] }
 0x116   : > { %v1257_v21 = vpop.f32.mrb[2].mxu0  ;;  %v1453_v22 = vpack.i.bf16 %v1847_v17, %v1849_v19  ;;  %v1290_v52 = vpack.c.bf16 %v1847_v17, %v1849_v19 }
 0x117   : > { %v1853_v23 = vadd.f32 %v1257_v21, %v327_v20  ;;  %v418_v24 = vpop.f32.mrb[3].mxu0 }
 0x118   : > { %v1855_v25 = vadd.f32 %v418_v24, %v322_v14  ;;  %1454 = vrot.lane.b32.xlu0 %v1453_v22, %s1656_s29  ;;  %v486_v14 = vld [vmem:[%s2212_s3 + $0x38] sm:$0xff] }
 0x11a   : > { %v1458_v26 = vpack.i.bf16 %v1853_v23, %v1855_v25  ;;  %v1293_v56 = vpack.c.bf16 %v1853_v23, %v1855_v25 }
 0x11c   : > { %1459 = vrot.lane.b32.xlu1 %v1458_v26, %s1656_s29  ;;  %1464 = vrot.lane.b32.xlu0 %v1453_v22, %s2218_s19 }
 0x120   : > { %1469 = vrot.lane.b32.xlu1 %v1458_v26, %s2218_s19  ;;  %1474 = vrot.lane.b32.xlu0 %v1453_v22, %s1658_s12 }
 0x124   : > { %1479 = vrot.lane.b32.xlu1 %v1458_v26, %s1658_s12  ;;  %1484 = vrot.lane.b32.xlu0 %v1453_v22, %s1659_s21 }
 0x128   : > { %1489 = vrot.lane.b32.xlu1 %v1458_v26, %s1659_s21  ;;  %493 = vperm.xlu0 %1451, %v487_v27  }
 0x12c   : > { %498 = vperm.xlu1 %1452, %v488_v28   ;;  %503 = vperm.xlu0 %1451, %v489_v29  }
 0x130   : > { %508 = vperm.xlu1 %1452, %v490_v30  }
 0x18a   : > { %v1455_v34 = vpop.permute.xlu0 %1454 }
 0x18b   : > { %v1457_v35 = vunpack.i.h.bf16 %v1455_v34  ;;  %v1456_v36 = vunpack.i.l.bf16 %v1455_v34 }
 0x18d   : > { %v1274_v38 = vpack.c.bf16 %v1457_v35, %v1456_v36 }
 0x18e   : > { %v1460_v39 = vpop.permute.xlu1 %1459  ;;  %v1465_v40 = vpop.permute.xlu0 %1464 }
 0x18f   : > { %v1462_v41 = vunpack.i.h.bf16 %v1460_v39  ;;  %v1461_v42 = vunpack.i.l.bf16 %v1460_v39  ;;  %1276 = vmatpush1.bf16.msk.msra.mxu1 %vm1886_vm3, %v1274_v38  ;;  %v1467_v44 = vunpack.i.h.bf16 %v1465_v40  ;;  %v1466_v45 = vunpack.i.l.bf16 %v1465_v40 }
 0x190   : > { %1277 = vmatprep.subr.bf16.mxu1 %v1655_v13 }
 0x191   : > { %v1278_v43 = vpack.c.bf16 %v1462_v41, %v1461_v42  ;;  %v1282_v48 = vpack.c.bf16 %v1467_v44, %v1466_v45 }
 0x192   : > { %v1470_v46 = vpop.permute.xlu1 %1469  ;;  %v1475_v53 = vpop.permute.xlu0 %1474 }
 0x193   : > { %1280 = vmatpush1.bf16.msk.msra.mxu1 %vm1886_vm3, %v1278_v43  ;;  %v1472_v49 = vunpack.i.h.bf16 %v1470_v46  ;;  %v1471_v50 = vunpack.i.l.bf16 %v1470_v46  ;;  %v1477_v54 = vunpack.i.h.bf16 %v1475_v53  ;;  %v1476_v55 = vunpack.i.l.bf16 %v1475_v53 }
 0x194   : > { %1281 = vmatprep.subr.bf16.mxu1 %v1655_v13 }
 0x195   : > { %v1286_v51 = vpack.c.bf16 %v1472_v49, %v1471_v50  ;;  %v1296_v59 = vpack.c.bf16 %v1477_v54, %v1476_v55  ;;  %v1168_v49 = vld [vmem:[%s2212_s3 + $0x48] sm:$0xff] }
 0x196   : > { %v1480_v57 = vpop.permute.xlu1 %1479  ;;  %v1485_v62 = vpop.permute.xlu0 %1484  ;;  %1195 = vmatprep.mubr.msk.f32.mxu0 %vm511_vm1, %v1168_v49  ;;  %v1200_v49 = vld [vmem:[%s2212_s3 + $0x88] sm:$0xff] }
 0x197   : > { %1284 = vmatpush1.bf16.msk.msra.mxu1 %vm1897_vm5, %v1282_v48  ;;  %v1482_v60 = vunpack.i.h.bf16 %v1480_v57  ;;  %v1481_v61 = vunpack.i.l.bf16 %v1480_v57  ;;  %v1487_v0 = vunpack.i.h.bf16 %v1485_v62  ;;  %v1486_v1 = vunpack.i.l.bf16 %v1485_v62  ;;  %v1177_v48 = vld [vmem:[%s2213_s4 + $0x30] sm:$0xff] }
 0x198   : > { %1285 = vmatprep.subr.bf16.mxu1 %v1655_v13 }
 0x199   : > { %v1300_v63 = vpack.c.bf16 %v1482_v60, %v1481_v61  ;;  %v1304_v4 = vpack.c.bf16 %v1487_v0, %v1486_v1 }
 0x19a   : > { %v1490_v2 = vpop.permute.xlu1 %1489 }
 0x19b   : > { %1288 = vmatpush1.bf16.msk.msra.mxu1 %vm1897_vm5, %v1286_v51  ;;  %v1492_v5 = vunpack.i.h.bf16 %v1490_v2  ;;  %v1491_v6 = vunpack.i.l.bf16 %v1490_v2 }
 0x19c   : > { %1289 = vmatprep.subr.bf16.mxu1 %v1655_v13 }
 0x19d   : > { %v1308_v7 = vpack.c.bf16 %v1492_v5, %v1491_v6 }
 0x19f   : > { %1291 = vmatpush1.bf16.msra.mxu1 %v1290_v52 }
 0x1a0   : > { %1292 = vmatprep.subr.bf16.mxu1 %v1655_v13 }
 0x1a3   : > { %1294 = vmatpush1.bf16.msra.mxu1 %v1293_v56 }
 0x1a4   : > { %1295 = vmatprep.subr.bf16.mxu1 %v1655_v13 }
 0x1a7   : > { %1298 = vmatpush1.bf16.msk.msra.mxu1 %vm1914_vm7, %v1296_v59  ;;  %v494_v16 = vpop.permute.xlu0 %493 }
 0x1a8   : > { %1299 = vmatprep.subr.bf16.mxu1 %v1655_v13 }
 0x1ab   : > { %1302 = vmatpush1.bf16.msk.msra.mxu1 %vm1914_vm7, %v1300_v63  ;;  %v499_v22 = vpop.permute.xlu1 %498  ;;  %v504_v30 = vpop.permute.xlu0 %503 }
 0x1ac   : > { %1303 = vmatprep.subr.bf16.mxu1 %v1655_v13 }
 0x1af   : > { %1306 = vmatpush1.bf16.msk.msra.mxu1 %vm1925_vm9, %v1304_v4  ;;  %v509_v39 = vpop.permute.xlu1 %508 }
 0x1b0   : > { %1307 = vmatprep.subr.bf16.mxu1 %v1655_v13 }
 0x1b3   : > { %1310 = vmatpush1.bf16.msk.msra.mxu1 %vm1925_vm9, %v1308_v7  ;;  %v1167_v7 = vld [vmem:[%s2212_s3 + $0x40] sm:$0xff] }
 0x1b4   : > { %1349 = vmatprep.subr.bf16.mxu1 %v1655_v13 }
 0x1b6   : > { %589 = vmatmul.mubr.f32.vlgmr.msra.gmra.mrb[0].mxu1 %v479_v8  ;;  %v1170_v8 = vld [vmem:[%s2212_s3 + $0x58] sm:$0xff] }
 0x1b7   : > { %1164 = vmatprep.mubr.msk.f32.mxu1 %vm511_vm1, %v482_v9  ;;  %v1169_v9 = vld [vmem:[%s2212_s3 + $0x50] sm:$0xff] }
 0x1ba   : > { %594 = vmatmul.mubr.f32.gmra.mrb[2].mxu1 %v481_v10  ;;  %v1172_v10 = vld [vmem:[%s2212_s3 + $0x68] sm:$0xff] }
 0x1bb   : > { %1165 = vmatprep.mubr.msk.f32.mxu1 %vm511_vm1, %v484_v11  ;;  %v1171_v11 = vld [vmem:[%s2212_s3 + $0x60] sm:$0xff] }
 0x1be   : > { %599 = vmatmul.mubr.f32.gmra.mrb[4].mxu1 %v483_v12  ;;  %v1174_v12 = vld [vmem:[%s2212_s3 + $0x78] sm:$0xff] }
 0x1bf   : > { %1166 = vmatprep.mubr.msk.f32.mxu1 %vm511_vm1, %v486_v14  ;;  %v1173_v14 = vld [vmem:[%s2212_s3 + $0x70] sm:$0xff] }
 0x1c2   : > { %604 = vmatmul.mubr.f32.gmra.mrb[6].mxu1 %v485_v15 }
 0x1c3   : > { %1227 = vmatprep.mubr.msk.f32.mxu1 %vm511_vm1, %v1200_v49 }
 0x289   : > { %v590_v18 = vpop.f32.mrb[0].mxu1 }
 0x28a   : > { %v591_v20 = vadd.f32 %v590_v18, %v494_v16  ;;  %v592_v21 = vpop.f32.mrb[1].mxu1 }
 0x28c   : > { %v609_v26 = vmax.f32 %v591_v20, 0.0 }
 0x28d   : > { %v595_v24 = vpop.f32.mrb[2].mxu1 }
 0x28e   : > { %v596_v27 = vadd.f32 %v595_v24, %v499_v22  ;;  %v597_v28 = vpop.f32.mrb[3].mxu1  ;;  %v1960_v32 = vadd.f32 %v609_v26, %v1849_v19 }
 0x290   : > { %v610_v29 = vmax.f32 %v596_v27, 0.0 }
 0x291   : > { %v600_v31 = vpop.f32.mrb[4].mxu1 }
 0x292   : > { %v1963_v34 = vadd.f32 %v610_v29, %v1847_v17  ;;  %v601_v35 = vadd.f32 %v600_v31, %v504_v30  ;;  %v602_v36 = vpop.f32.mrb[5].mxu1  ;;  %v1175_v17 = vld [vmem:[%s2213_s4 + $0x20] sm:$0xff] }
 0x294   : > { %v1493_v38 = vpack.i.bf16 %v1963_v34, %v1960_v32  ;;  %v611_v41 = vmax.f32 %v601_v35, 0.0  ;;  %v1328_v33 = vpack.c.bf16 %v1963_v34, %v1960_v32 }
 0x295   : > { %v605_v40 = vpop.f32.mrb[6].mxu1 }
 0x296   : > { %v606_v42 = vadd.f32 %v605_v40, %v509_v39  ;;  %v607_v43 = vpop.f32.mrb[7].mxu1  ;;  %1494 = vrot.lane.b32.xlu0 %v1493_v38, %s1660_s20  ;;  %v1968_v45 = vadd.f32 %v611_v41, %v1855_v25  ;;  %v1178_v25 = vld [vmem:[%s2213_s4 + $0x38] sm:$0xff] }
 0x298   : > { %v612_v44 = vmax.f32 %v606_v42, 0.0 }
 0x29a   : > { %v1971_v19 = vadd.f32 %v612_v44, %v1853_v23  ;;  %1504 = vrot.lane.b32.xlu0 %v1493_v38, %s1661_s22  ;;  %v1176_v23 = vld [vmem:[%s2213_s4 + $0x28] sm:$0xff] }
 0x29c   : > { %v1498_v46 = vpack.i.bf16 %v1971_v19, %v1968_v45  ;;  %v1331_v6 = vpack.c.bf16 %v1971_v19, %v1968_v45 }
 0x29e   : > { %1499 = vrot.lane.b32.xlu1 %v1498_v46, %s1660_s20  ;;  %659 = vperm.xlu0 %1451, %v1175_v17   ;;  %s2165_s20 = scalar_lea.hbm %s2216_s7, %s1233_s23 }
 0x2a2   : > { %1509 = vrot.lane.b32.xlu1 %v1498_v46, %s1661_s22  ;;  %669 = vperm.xlu0 %1451, %v1177_v48   ;;  %v1208_v48 = vld [vmem:[%s2213_s4 + $0x48] sm:$0xff] }
 0x2a6   : > { %664 = vperm.xlu1 %1452, %v1176_v23   ;;  %v970_v23 = vld [vmem:[%s2215_s6] sm:$0xff] }
 0x2aa   : > { %674 = vperm.xlu1 %1452, %v1178_v25   ;;  %v1210_v25 = vld [vmem:[%s2213_s4 + $0x58] sm:$0xff] }
 0x308   : > { %v1495_v50 = vpop.permute.xlu0 %1494 }
 0x309   : > { %v1497_v51 = vunpack.i.h.bf16 %v1495_v50  ;;  %v1496_v52 = vunpack.i.l.bf16 %v1495_v50 }
 0x30b   : > { %v1312_v54 = vpack.c.bf16 %v1497_v51, %v1496_v52 }
 0x30c   : > { %v1505_v55 = vpop.permute.xlu0 %1504 }
 0x30d   : > { %1314 = vmatpush1.bf16.msk.msra.mxu0 %vm1992_vm11, %v1312_v54  ;;  %v1507_v60 = vunpack.i.h.bf16 %v1505_v55  ;;  %v1506_v61 = vunpack.i.l.bf16 %v1505_v55 }
 0x30e   : > { %1315 = vmatprep.subr.bf16.mxu0 %v1655_v13 }
 0x30f   : > { %v1320_v1 = vpack.c.bf16 %v1507_v60, %v1506_v61 }
 0x310   : > { %v1500_v56 = vpop.permute.xlu1 %1499 }
 0x311   : > { %v1502_v57 = vunpack.i.h.bf16 %v1500_v56  ;;  %v1501_v59 = vunpack.i.l.bf16 %v1500_v56 }
 0x313   : > { %v1316_v62 = vpack.c.bf16 %v1502_v57, %v1501_v59 }
 0x314   : > { %v1510_v63 = vpop.permute.xlu1 %1509 }
 0x315   : > { %1318 = vmatpush1.bf16.msk.msra.mxu0 %vm1992_vm11, %v1316_v62  ;;  %v1512_v2 = vunpack.i.h.bf16 %v1510_v63  ;;  %v1511_v4 = vunpack.i.l.bf16 %v1510_v63 }
 0x316   : > { %1319 = vmatprep.subr.bf16.mxu0 %v1655_v13 }
 0x317   : > { %v1324_v5 = vpack.c.bf16 %v1512_v2, %v1511_v4 }
 0x319   : > { %1322 = vmatpush1.bf16.msk.msra.mxu0 %vm2003_vm13, %v1320_v1 }
 0x31a   : > { %1323 = vmatprep.subr.bf16.mxu0 %v1655_v13 }
 0x31d   : > { %1326 = vmatpush1.bf16.msk.msra.mxu0 %vm2003_vm13, %v1324_v5  ;;  %v660_v15 = vpop.permute.xlu0 %659 }
 0x31e   : > { %1327 = vmatprep.subr.bf16.mxu0 %v1655_v13 }
 0x321   : > { %1329 = vmatpush1.bf16.msra.mxu0 %v1328_v33  ;;  %v670_v29 = vpop.permute.xlu0 %669 }
 0x322   : > { %1330 = vmatprep.subr.bf16.mxu0 %v1655_v13 }
 0x325   : > { %1332 = vmatpush1.bf16.msra.mxu0 %v1331_v6  ;;  %v665_v21 = vpop.permute.xlu1 %664 }
 0x326   : > { %1333 = vmatprep.subr.bf16.mxu0 %v1655_v13 }
 0x329   : > { %1336 = vmatpush1.bf16.msk.msra.mxu0 %vm1992_vm11, %v1312_v54  ;;  %v675_v40 = vpop.permute.xlu1 %674 }
 0x32a   : > { %1337 = vmatprep.subr.bf16.mxu0 %v1655_v13 }
 0x32d   : > { %1340 = vmatpush1.bf16.msk.msra.mxu0 %vm1992_vm11, %v1316_v62 }
 0x32e   : > { %1341 = vmatprep.subr.bf16.mxu0 %v1655_v13 }
 0x331   : > { %1344 = vmatpush1.bf16.msk.msra.mxu0 %vm2003_vm13, %v1320_v1 }
 0x332   : > { %1345 = vmatprep.subr.bf16.mxu0 %v1655_v13 }
 0x335   : > { %1348 = vmatpush1.bf16.msk.msra.mxu0 %vm2003_vm13, %v1324_v5 }
 0x336   : > { %1387 = vmatprep.subr.bf16.mxu0 %v1655_v13 }
 0x338   : > { %754 = vmatmul.mubr.f32.vlgmr.msra.gmra.mrb[4].mxu0 %v1167_v7 }
 0x339   : > { %1196 = vmatprep.mubr.msk.f32.mxu0 %vm511_vm1, %v1170_v8 }
 0x33c   : > { %759 = vmatmul.mubr.f32.gmra.mrb[6].mxu0 %v1169_v9 }
 0x33d   : > { %1197 = vmatprep.mubr.msk.f32.mxu0 %vm511_vm1, %v1172_v10 }
 0x340   : > { %764 = vmatmul.mubr.f32.gmra.mrb[8].mxu0 %v1171_v11 }
 0x341   : > { %1198 = vmatprep.mubr.msk.f32.mxu0 %vm511_vm1, %v1174_v12 }
 0x344   : > { %769 = vmatmul.mubr.f32.gmra.mrb[10].mxu0 %v1173_v14 }
 0x40b   : > { %v755_v16 = vpop.f32.mrb[4].mxu0 }
 0x40c   : > { %v756_v18 = vadd.f32 %v755_v16, %v660_v15  ;;  %v757_v20 = vpop.f32.mrb[5].mxu0 }
 0x40e   : > { %v774_v24 = vmax.f32 %v756_v18, 0.0 }
 0x40f   : > { %v760_v22 = vpop.f32.mrb[6].mxu0 }
 0x410   : > { %v761_v26 = vadd.f32 %v760_v22, %v665_v21  ;;  %v762_v27 = vpop.f32.mrb[7].mxu0  ;;  %v2056_v31 = vadd.f32 %v774_v24, %v1960_v32  ;;  %v1199_v22 = vld [vmem:[%s2212_s3 + $0x80] sm:$0xff]  ;;  %v1201_v24 = vld [vmem:[%s2212_s3 + $0x90] sm:$0xff] }
 0x411   : > { %v1206_v27 = vld [vmem:[%s2212_s3 + $0xb8] sm:$0xff] }
 0x412   : > { %v775_v28 = vmax.f32 %v761_v26, 0.0  ;;  %v1203_v26 = vld [vmem:[%s2212_s3 + $0xa0] sm:$0xff] }
 0x413   : > { %v765_v30 = vpop.f32.mrb[8].mxu0 }
 0x414   : > { %v2059_v35 = vadd.f32 %v775_v28, %v1963_v34  ;;  %v766_v36 = vadd.f32 %v765_v30, %v670_v29  ;;  %v767_v38 = vpop.f32.mrb[9].mxu0  ;;  %v1205_v28 = vld [vmem:[%s2212_s3 + $0xb0] sm:$0xff]  ;;  %v1663_v29 = vmov 0.0  }
 0x415   : > { %1266 = vmatprep.mubr.msk.f32.mxu0 %vm1662_vm14, %v1663_v29 }
 0x416   : > { %v1513_v39 = vpack.i.bf16 %v2059_v35, %v2056_v31  ;;  %v776_v42 = vmax.f32 %v766_v36, 0.0  ;;  %v1366_v58 = vpack.c.bf16 %v2059_v35, %v2056_v31 }
 0x417   : > { %v770_v41 = vpop.f32.mrb[10].mxu0 }
 0x418   : > { %v771_v43 = vadd.f32 %v770_v41, %v675_v40  ;;  %v772_v44 = vpop.f32.mrb[11].mxu0  ;;  %1514 = vrot.lane.b32.xlu0 %v1513_v39, %s1658_s12  ;;  %v2065_v46 = vadd.f32 %v776_v42, %v1968_v45  ;;  %v1207_v45 = vld [vmem:[%s2213_s4 + $0x40] sm:$0xff] }
 0x41a   : > { %v777_v17 = vmax.f32 %v771_v43, 0.0 }
 0x41c   : > { %v2068_v32 = vadd.f32 %v777_v17, %v1971_v19  ;;  %1524 = vrot.lane.b32.xlu0 %v1513_v39, %s1659_s21  ;;  %v1209_v19 = vld [vmem:[%s2213_s4 + $0x50] sm:$0xff] }
 0x41e   : > { %v1518_v34 = vpack.i.bf16 %v2068_v32, %v2065_v46  ;;  %v1369_v6 = vpack.c.bf16 %v2068_v32, %v2065_v46 }
 0x420   : > { %1519 = vrot.lane.b32.xlu1 %v1518_v34, %s1658_s12  ;;  %1534 = vrot.lane.b32.xlu0 %v1513_v39, %s1656_s29  ;;  %s296_s12 = scalar_lea.vmem [#allocation5], %s1142_s15 }
 0x421   : > { %s1064_s9 = sshll.u32 %s296_s12, 4  ;;  %s2167_s9 = int_to_ptr.vmem [resolvable:$true] %s1064_s9 }
 0x422   : > { %s1583_s22 = scalar_lea.vmem %s2167_s9, 128  ;;  %p1590_p8 = scmp.lt.s32.totalorder %s2167_s9, %s1588_s8 }
 0x423   : > { %p1584_p6 = scmp.ne.s32.totalorder %s2167_s9, %s1583_s22 }
 0x424   : > { %1529 = vrot.lane.b32.xlu1 %v1518_v34, %s1659_s21  ;;  %1544 = vrot.lane.b32.xlu0 %v1513_v39, %s2237_s11 }
 0x425   : > { %p1585_p12 = pnand %p1584_p6, %p2238_p11 }
 0x427   : > { %p1586_p13 = pneg %p1585_p12 }
 0x428   : > { %1539 = vrot.lane.b32.xlu1 %v1518_v34, %s1656_s29  ;;  %846 = vperm.xlu0 %1451, %v1207_v45   ;;  %s1051_s29 = scalar_lea.sflag [#allocation4], %s1809_s16 }
 0x42c   : > { %1549 = vrot.lane.b32.xlu1 %v1518_v34, %s2237_s11  ;;  %856 = vperm.xlu0 %1451, %v1209_v19   ;;  %s1589_s11 = scalar_lea.vmem %s1588_s8, 256 }
 0x42d   : > { %p1591_p10 = scmp.lt.s32.totalorder %s1589_s11, %s1583_s22 }
 0x42f   : > { %p1592_p0 = por %p1591_p10, %p1590_p8 }
 0x430   : > { %851 = vperm.xlu1 %1452, %v1208_v48   ;;  %973 = vperm.xlu0 %1451, %v970_v23  }
 0x431   : > { %p1593_p2 = pnand %p1592_p0, %p1586_p13 }
 0x434   : > { %861 = vperm.xlu1 %1452, %v1210_v25  }
 0x48a   : > { %v1515_v50 = vpop.permute.xlu0 %1514 }
 0x48b   : > { %v1517_v51 = vunpack.i.h.bf16 %v1515_v50  ;;  %v1516_v52 = vunpack.i.l.bf16 %v1515_v50 }
 0x48d   : > { %v1350_v53 = vpack.c.bf16 %v1517_v51, %v1516_v52 }
 0x48e   : > { %v1525_v54 = vpop.permute.xlu0 %1524 }
 0x48f   : > { %1352 = vmatpush1.bf16.msk.msra.mxu1 %vm1914_vm7, %v1350_v53  ;;  %v1527_v59 = vunpack.i.h.bf16 %v1525_v54  ;;  %v1526_v60 = vunpack.i.l.bf16 %v1525_v54 }
 0x490   : > { %1353 = vmatprep.subr.bf16.mxu1 %v1655_v13 }
 0x491   : > { %v1358_v63 = vpack.c.bf16 %v1527_v59, %v1526_v60 }
 0x492   : > { %v1520_v55 = vpop.permute.xlu1 %1519  ;;  %v1535_v4 = vpop.permute.xlu0 %1534 }
 0x493   : > { %v1522_v56 = vunpack.i.h.bf16 %v1520_v55  ;;  %v1521_v57 = vunpack.i.l.bf16 %v1520_v55  ;;  %v1537_v5 = vunpack.i.h.bf16 %v1535_v4  ;;  %v1536_v33 = vunpack.i.l.bf16 %v1535_v4 }
 0x495   : > { %v1354_v61 = vpack.c.bf16 %v1522_v56, %v1521_v57  ;;  %v1372_v3 = vpack.c.bf16 %v1537_v5, %v1536_v33  ;;  %v969_v57 = vld [vmem:[%s2214_s5] sm:$0xff] }
 0x496   : > { %v1530_v62 = vpop.permute.xlu1 %1529  ;;  %v1545_v10 = vpop.permute.xlu0 %1544 }
 0x497   : > { %1356 = vmatpush1.bf16.msk.msra.mxu1 %vm1914_vm7, %v1354_v61  ;;  %v1532_v0 = vunpack.i.h.bf16 %v1530_v62  ;;  %v1531_v1 = vunpack.i.l.bf16 %v1530_v62  ;;  %v1547_v11 = vunpack.i.h.bf16 %v1545_v10  ;;  %v1546_v12 = vunpack.i.l.bf16 %v1545_v10 }
 0x498   : > { %1357 = vmatprep.subr.bf16.mxu1 %v1655_v13 }
 0x499   : > { %v1362_v2 = vpack.c.bf16 %v1532_v0, %v1531_v1  ;;  %v1380_v16 = vpack.c.bf16 %v1547_v11, %v1546_v12 }
 0x49a   : > { %v1540_v7 = vpop.permute.xlu1 %1539 }
 0x49b   : > { %1360 = vmatpush1.bf16.msk.msra.mxu1 %vm1925_vm9, %v1358_v63  ;;  %v1542_v8 = vunpack.i.h.bf16 %v1540_v7  ;;  %v1541_v9 = vunpack.i.l.bf16 %v1540_v7 }
 0x49c   : > { %1361 = vmatprep.subr.bf16.mxu1 %v1655_v13 }
 0x49d   : > { %v1376_v14 = vpack.c.bf16 %v1542_v8, %v1541_v9 }
 0x49e   : > { %v1550_v15 = vpop.permute.xlu1 %1549 }
 0x49f   : > { %1364 = vmatpush1.bf16.msk.msra.mxu1 %vm1925_vm9, %v1362_v2  ;;  %v1552_v18 = vunpack.i.h.bf16 %v1550_v15  ;;  %v1551_v20 = vunpack.i.l.bf16 %v1550_v15 }
 0x4a0   : > { %1365 = vmatprep.subr.bf16.mxu1 %v1655_v13 }
 0x4a1   : > { %v1384_v21 = vpack.c.bf16 %v1552_v18, %v1551_v20 }
 0x4a3   : > { %1367 = vmatpush1.bf16.msra.mxu1 %v1366_v58 }
 0x4a4   : > { %1368 = vmatprep.subr.bf16.mxu1 %v1655_v13 }
 0x4a7   : > { %1370 = vmatpush1.bf16.msra.mxu1 %v1369_v6  ;;  %v847_v30 = vpop.permute.xlu0 %846 }
 0x4a8   : > { %1371 = vmatprep.subr.bf16.mxu1 %v1655_v13 }
 0x4ab   : > { %1374 = vmatpush1.bf16.msk.msra.mxu1 %vm1886_vm3, %v1372_v3  ;;  %v857_v34 = vpop.permute.xlu0 %856 }
 0x4ac   : > { %1375 = vmatprep.subr.bf16.mxu1 %v1655_v13 }
 0x4af   : > { %1378 = vmatpush1.bf16.msk.msra.mxu1 %vm1886_vm3, %v1376_v14  ;;  %v852_v40 = vpop.permute.xlu1 %851 }
 0x4b0   : > { %1379 = vmatprep.subr.bf16.mxu1 %v1655_v13 }
 0x4b3   : > { %1382 = vmatpush1.bf16.msk.msra.mxu1 %vm1897_vm5, %v1380_v16  ;;  %v862_v50 = vpop.permute.xlu1 %861 }
 0x4b4   : > { %1383 = vmatprep.subr.bf16.mxu1 %v1655_v13 }
 0x4b7   : > { %1386 = vmatpush1.bf16.msk.msra.mxu1 %vm1897_vm5, %v1384_v21 }
 0x4ba   : > { %941 = vmatmul.mubr.f32.vlgmr.msra.gmra.mrb[8].mxu1 %v1199_v22 }
 0x4bb   : > { %1228 = vmatprep.mubr.msk.f32.mxu1 %vm511_vm1, %v1202_v37 }
 0x4be   : > { %946 = vmatmul.mubr.f32.gmra.mrb[10].mxu1 %v1201_v24 }
 0x4bf   : > { %1229 = vmatprep.mubr.msk.f32.mxu1 %vm511_vm1, %v1204_v47 }
 0x4c2   : > { %951 = vmatmul.mubr.f32.gmra.mrb[12].mxu1 %v1203_v26 }
 0x4c3   : > { %1230 = vmatprep.mubr.msk.f32.mxu1 %vm511_vm1, %v1206_v27 }
 0x4c6   : > { %956 = vmatmul.mubr.f32.gmra.mrb[14].mxu1 %v1205_v28 }
 0x58d   : > { %v942_v36 = vpop.f32.mrb[8].mxu1 }
 0x58e   : > { %v943_v38 = vadd.f32 %v942_v36, %v847_v30  ;;  %v944_v39 = vpop.f32.mrb[9].mxu1 }
 0x590   : > { %v961_v42 = vmax.f32 %v943_v38, 0.0 }
 0x591   : > { %v947_v41 = vpop.f32.mrb[10].mxu1 }
 0x592   : > { %v948_v43 = vadd.f32 %v947_v41, %v852_v40  ;;  %v949_v44 = vpop.f32.mrb[11].mxu1  ;;  %v965_v19 = vadd.f32 %v961_v42, %v2056_v31 }
 0x594   : > { %v962_v17 = vmax.f32 %v948_v43, 0.0 }
 0x595   : > { %v952_v45 = vpop.f32.mrb[12].mxu1 }
 0x596   : > { %v966_v48 = vadd.f32 %v962_v17, %v2059_v35  ;;  %v953_v23 = vadd.f32 %v952_v45, %v857_v34  ;;  %v954_v25 = vpop.f32.mrb[13].mxu1 }
 0x598   : > { %v1388_v49 = vpack.c.bf16 %v966_v48, %v965_v19  ;;  %v963_v52 = vmax.f32 %v953_v23, 0.0 }
 0x599   : > { %v957_v51 = vpop.f32.mrb[14].mxu1 }
 0x59a   : > { %v958_v53 = vadd.f32 %v957_v51, %v862_v50  ;;  %v959_v54 = vpop.f32.mrb[15].mxu1  ;;  %1389 = vmatpush3.bf16.msra.mxu0 %v1388_v49  ;;  %v967_v56 = vadd.f32 %v963_v52, %v2065_v46 }
 0x59b   : > { %1390 = vmatprep.subr.bf16.mxu0 %v1655_v13  ;;  %v974_v13 = vpop.permute.xlu0 %973 }
 0x59c   : > { %v964_v55 = vmax.f32 %v958_v53, 0.0 }
 0x59e   : > { %v968_v31 = vadd.f32 %v964_v55, %v2068_v32 }
 0x5a0   : > { %v1391_v35 = vpack.c.bf16 %v968_v31, %v967_v56 }
 0x5a2   : > { %1392 = vmatpush3.bf16.msra.mxu0 %v1391_v35 }
 0x5a5   : > { %1267 = vmatmul.mubr.msk.f32.vlgmr.msra.gmra.mrb[12].mxu0 %vm511_vm1, %v969_v57 }
 0x678   : > { %v1045_v59 = vpop.f32.mrb[12].mxu0 }
 0x679   : > { %v1046_v60 = vadd.f32 %v1045_v59, %v974_v13  ;;  %v1268_v46 = vpop.f32.mrb[13].mxu0 }
 0x67b   : > { %1049 = vst [vmem:[%s296_s12] sm:$0xff] %v1046_v60 }
 0x67c   : > { %1596 = shalt.err (!%p1593_p2)
}
 0x67d   : > { %s1597_s16 = scalar_lea.hbm %s2165_s20, 128  ;;  %s1601_s15 = scalar_lea.hbm %s2216_s7, 256 }
 0x67e   : > { %p1598_p4 = scmp.ne.s32.totalorder %s2165_s20, %s1597_s16  ;;  %p1602_p9 = scmp.lt.u32.totalorder %s2165_s20, %s2216_s7 }
 0x67f   : > { %p1603_p1 = scmp.lt.u32.totalorder %s1601_s15, %s1597_s16  ;;  %p1605_p6 = scmp.lt.u32.totalorder %s1597_s16, %s2165_s20 }
 0x680   : > { %p1599_p5 = pnand %p1598_p4, %p2238_p11 }
 0x681   : > { %p1604_p3 = por %p1603_p1, %p1602_p9 }
 0x682   : > { %p1600_p7 = pneg %p1599_p5 }
 0x683   : > { %p1606_p12 = por %p1605_p6, %p1604_p3 }
 0x685   : > { %p1607_p13 = pnand %p1606_p12, %p1600_p7 }
 0x687   : > { %1610 = shalt.err (!%p1607_p13)
}
 0x688   : > { %1395 = dma.vmem_to_hbm [thread:$0]  (%p2238_p11), %s2167_s9, 128, %s2165_s20, %s1051_s29  }
 0x689 PF: > { %s1076_s21 = sand.u32 1, %s1637_s24   ;;  %p2239_p8 = scmp.ne.s32.totalorder %s2223_s14, 0 }
 0x68a   : > { %p2240_p10 = scmp.ge.s32.totalorder %s1649_s27, 2  ;;  %s1077_s19 = scalar_lea.sflag [#allocation4], %s1076_s21 }
 0x68c   : > { %p1402_p0 = pnand %p2240_p10, %p2239_p8 }
 0x68e   : > { %1632 = dma.done.wait (!%p1402_p0), %s1077_s19, 128  }
 0x68f   : > { %1634 = vsyncadd (!%p1402_p0), %s1077_s19, 4294967168  ;;  %p20_p2 = scmp.ge.s32.totalorder %s1730_s30, 4   ;;  %s2241_s24 = smov %s1641_s25 }
 0x690   : > { %s2242_s25 = smov %s1645_s26  ;;  %s2243_s26 = smov %s1742_s10 }
 0x691   : > { %s2244_s27 = smov %s1730_s30  ;;  %22 = sbr.rel (!%p20_p2) target bundleno = 5 (0x5), region = 97 }
 0x698   :  { %1082 = vsyncpa [#allocation3], 1 }
 0x699   :  { %1084 = vsyncpa [#allocation3 + $0x1], 1 }
 0x69a   :  { %1085 = vsyncpa [#allocation4], 1 }
 0x69b   :  { %1087 = vsyncpa [#allocation4 + $0x1], 1 }

</bundles_post_ra>
